<compile_context>
chip_gen: v7x
topology: tpu7x:2x2x1
jax: 0.10.0
libtpu: 0.0.40
codegen_flags: <defaults>
</compile_context>

<pallas_src>
import jax
import jax.numpy as jnp
from jax.experimental import pallas as pl
from jax.experimental.pallas import tpu as pltpu


def _round_up(n, m):
    return ((n + m - 1) // m) * m


def policy_net_kernel(xT_ref, w1_ref, b1_ref, w2d_ref, b2d_ref, out_ref):
    # All data is batch-on-lanes (transposed), so every op below is lane-dense.
    xT = xT_ref[...]                                   # (4, TB)   f32

    # ---- Layer 1: Linear(4 -> 32) + ReLU (transposed) ----------------------
    # hT = relu(W1 @ xT + b1) ; W1 is the PyTorch (out=32, in=4) weight.
    hT = jnp.dot(w1_ref[...], xT, preferred_element_type=jnp.float32)  # (32, TB)
    hT = jnp.maximum(hT + b1_ref[...], 0.0)            # b1 (32,1) broadcasts over lanes

    # ---- Layer 2 folded into the logit difference ---------------------------
    # d = (W2[1]-W2[0]) @ hT + (b2[1]-b2[0])  ->  (1, TB) dense lane row
    d = jnp.dot(w2d_ref[...], hT, preferred_element_type=jnp.float32)  # (1, TB)
    d = d + b2d_ref[...]

    # ---- 2-class softmax == sigmoid of the logit difference -----------------
    # softmax([l0, l1]) = [sigmoid(l0-l1), sigmoid(l1-l0)];  exact, no reduce.
    p1 = 1.0 / (1.0 + jnp.exp(-d))                     # (1, TB)  exp -> EUP slot
    p0 = 1.0 / (1.0 + jnp.exp(d))                      # keep 2nd exp (precision)

    out_ref[...] = jnp.concatenate([p0, p1], axis=0).astype(out_ref.dtype)  # (2, TB)

    # TODO(synk): optionally fuse PolicyNet.p here (categorical sample +
    # log_prob) with pltpu.prng_seed + pltpu.prng_random_bits, emitting extra
    # lane-dense (1, TB) rows, to remove the second launch + probs round-trip
    # per rollout step.


def policy_net_forward(x, w1, b1, w2, b2, *, max_block_b=2048):
    """x: (B, 4) f32.  Params in PyTorch layout: w1 (32,4), b1 (32,), w2 (2,32), b2 (2,).

    Returns (B, 2) f32 action probabilities (softmax over the last axis).
    """
    B = x.shape[0]

    # Batch tile rides the lane axis -> multiple of 128.  Cap at ceil(B/2)
    # (rounded up) so large batches always give >= 2 grid steps (v7x megacore).
    TB = max(128, _round_up((B + 1) // 2, 128))
    TB = min(TB, max_block_b)
    B_pad = _round_up(B, TB)
    grid = (B_pad // TB,)

    # Transposed (and, if needed, zero-padded) input: (4, B_pad), batch on lanes.
    if B_pad != B:
        xT = jnp.zeros((4, B_pad), x.dtype).at[:, :B].set(x.T)
    else:
        xT = x.T

    # Parameter prep: bias as a lane-broadcastable column, layer-2 as a diff row.
    b1_col = b1.reshape(32, 1).astype(jnp.float32)
    w2_diff = (w2[1] - w2[0]).reshape(1, 32).astype(jnp.float32)
    b2_diff = (b2[1] - b2[0]).reshape(1, 1).astype(jnp.float32)

    # VMEM: ~640 B per batch element (x + out double-buffered, hT temporary);
    # generous floor, stays under the 32 MiB scoped default on all generations.
    vmem_limit = int(min(32 * 1024 * 1024, max(8 * 1024 * 1024, 1024 * TB)))

    # Cost hint matching the compact layout: two small GEMMs, 2 exps/row, and
    # the real HBM traffic (x in, (2, B_pad) probs out, tiny weights).
    cost = pl.CostEstimate(
        flops=2 * B_pad * (4 * 32 + 32 * 1),
        transcendentals=2 * B_pad,
        bytes_accessed=4 * (4 * B_pad + 2 * B_pad + 32 * 4 + 32 + 32 + 1),
    )

    out_t = pl.pallas_call(
        policy_net_kernel,
        out_shape=jax.ShapeDtypeStruct((2, B_pad), jnp.float32),
        grid=grid,
        in_specs=[
            pl.BlockSpec((4, TB), lambda i: (0, i)),    # batch-tiled input (transposed)
            pl.BlockSpec((32, 4), lambda i: (0, 0)),    # weights stay VMEM-resident
            pl.BlockSpec((32, 1), lambda i: (0, 0)),
            pl.BlockSpec((1, 32), lambda i: (0, 0)),
            pl.BlockSpec((1, 1), lambda i: (0, 0)),
        ],
        out_specs=pl.BlockSpec((2, TB), lambda i: (0, i)),  # compact lane-dense output
        compiler_params=pltpu.CompilerParams(
            dimension_semantics=("parallel",),           # megacore sharding on v7x
            vmem_limit_bytes=vmem_limit,
        ),
        cost_estimate=cost,
    )(xT, w1, b1_col, w2_diff, b2_diff)

    return out_t[:, :B].T                                # (B, 2)


def init_params(key):
    """Deterministic init mimicking nn.Linear's uniform(-1/sqrt(fan_in), +), PyTorch layout."""
    k1, k2, k3, k4 = jax.random.split(key, 4)
    bound1 = 1.0 / jnp.sqrt(4.0)
    bound2 = 1.0 / jnp.sqrt(32.0)
    w1 = jax.random.uniform(k1, (32, 4), jnp.float32, -bound1, bound1)   # Linear(4,32).weight
    b1 = jax.random.uniform(k2, (32,), jnp.float32, -bound1, bound1)
    w2 = jax.random.uniform(k3, (2, 32), jnp.float32, -bound2, bound2)   # Linear(32,2).weight
    b2 = jax.random.uniform(k4, (2,), jnp.float32, -bound2, bound2)
    return w1, b1, w2, b2


def reference_forward(x, w1, b1, w2, b2):
    h = jnp.maximum(x @ w1.T + b1, 0.0)
    logits = h @ w2.T + b2
    return jax.nn.softmax(logits, axis=-1)


if __name__ == "__main__":
    key = jax.random.PRNGKey(0)
    k_params, k_x = jax.random.split(key)

    w1, b1, w2, b2 = init_params(k_params)

    # Small CartPole-like batches of 4-dim observations.
    # B=10 exercises the pad path; B=260 exercises a 2-step grid + pad path.
    for B in (8, 10, 260):
        x = jax.random.normal(jax.random.fold_in(k_x, B), (B, 4), jnp.float32)

        out = policy_net_forward(x, w1, b1, w2, b2)
        out = jax.block_until_ready(out)

        ref = reference_forward(x, w1, b1, w2, b2)
        assert out.shape == (B, 2)
        assert jnp.allclose(out, ref, atol=1e-5, rtol=1e-5), "mismatch vs reference"
        # rows of a softmax must sum to 1
        assert jnp.allclose(jnp.sum(out, axis=-1), 1.0, atol=1e-5)

    # NOTE: PolicyNet.p (Categorical sampling / log_prob) is policy glue outside
    # forward(); sampling lives in host-side JAX (jax.random.categorical) unless
    # fused per the TODO in the kernel.

    print("KERNEL_OK")
</pallas_src>

<mosaic_0001>
module attributes {stable_mosaic.version = 11 : i64} {
  func.func @policy_net_kernel(%arg0: i32, %arg1: memref<4x128xf32, #tpu.memory_space<vmem>>, %arg2: memref<32x4xf32, #tpu.memory_space<vmem>>, %arg3: memref<32x1xf32, #tpu.memory_space<vmem>>, %arg4: memref<1x32xf32, #tpu.memory_space<vmem>>, %arg5: memref<1x1xf32, #tpu.memory_space<vmem>>, %arg6: memref<2x128xf32, #tpu.memory_space<vmem>>) attributes {dimension_semantics = [#tpu.dimension_semantics<parallel>], iteration_bounds = array<i64: 1>, scalar_prefetch = 0 : i64, scratch_operands = 0 : i64, tpu.core_type = #tpu.core_type<tc>, window_params = [{transform_indices = @transform_0, window_bounds = array<i64: 4, 128>}, {pipeline_mode = #tpu.pipeline_mode<synchronous>, transform_indices = @transform_1, window_bounds = array<i64: 32, 4>}, {pipeline_mode = #tpu.pipeline_mode<synchronous>, transform_indices = @transform_2, window_bounds = array<i64: 32, 1>}, {pipeline_mode = #tpu.pipeline_mode<synchronous>, transform_indices = @transform_3, window_bounds = array<i64: 1, 32>}, {pipeline_mode = #tpu.pipeline_mode<synchronous>, transform_indices = @transform_4, window_bounds = array<i64: 1, 1>}, {transform_indices = @transform_5, window_bounds = array<i64: 2, 128>}]} {
    %c0 = arith.constant 0 : index
    %c0_0 = arith.constant 0 : index
    %0 = vector.load %arg1[%c0, %c0_0] : memref<4x128xf32, #tpu.memory_space<vmem>>, vector<4x128xf32>
    %c0_1 = arith.constant 0 : index
    %c0_2 = arith.constant 0 : index
    %1 = vector.load %arg2[%c0_1, %c0_2] : memref<32x4xf32, #tpu.memory_space<vmem>>, vector<32x4xf32>
    %cst = arith.constant dense<0.000000e+00> : vector<32x128xf32>
    %2 = tpu.matmul %1, %0, %cst {dimension_numbers = #tpu.dot_dimension_numbers<[1], [0], [0], [1], [0, 0, 1, 1], [], []>} : vector<32x4xf32>, vector<4x128xf32>, vector<32x128xf32> -> vector<32x128xf32>
    %c0_3 = arith.constant 0 : index
    %c0_4 = arith.constant 0 : index
    %3 = vector.load %arg3[%c0_3, %c0_4] : memref<32x1xf32, #tpu.memory_space<vmem>>, vector<32x1xf32>
    %4 = vector.broadcast %3 : vector<32x1xf32> to vector<32x128xf32>
    %5 = arith.addf %2, %4 : vector<32x128xf32>
    %cst_5 = arith.constant 0.000000e+00 : f32
    %6 = vector.broadcast %cst_5 : f32 to vector<32x128xf32>
    %7 = arith.maximumf %5, %6 : vector<32x128xf32>
    %c0_6 = arith.constant 0 : index
    %c0_7 = arith.constant 0 : index
    %8 = vector.load %arg4[%c0_6, %c0_7] : memref<1x32xf32, #tpu.memory_space<vmem>>, vector<1x32xf32>
    %cst_8 = arith.constant dense<0.000000e+00> : vector<1x128xf32>
    %9 = tpu.matmul %8, %7, %cst_8 {dimension_numbers = #tpu.dot_dimension_numbers<[1], [0], [0], [1], [0, 0, 1, 1], [], []>} : vector<1x32xf32>, vector<32x128xf32>, vector<1x128xf32> -> vector<1x128xf32>
    %c0_9 = arith.constant 0 : index
    %c0_10 = arith.constant 0 : index
    %10 = vector.load %arg5[%c0_9, %c0_10] : memref<1x1xf32, #tpu.memory_space<vmem>>, vector<1x1xf32>
    %11 = vector.broadcast %10 : vector<1x1xf32> to vector<1x128xf32>
    %12 = arith.addf %9, %11 : vector<1x128xf32>
    %cst_11 = arith.constant 0.000000e+00 : f32
    %13 = vector.broadcast %cst_11 : f32 to vector<1x128xf32>
    %14 = arith.subf %13, %12 : vector<1x128xf32>
    %15 = math.exp %14 : vector<1x128xf32>
    %cst_12 = arith.constant 1.000000e+00 : f32
    %16 = vector.broadcast %cst_12 : f32 to vector<1x128xf32>
    %17 = arith.addf %16, %15 : vector<1x128xf32>
    %cst_13 = arith.constant 1.000000e+00 : f32
    %18 = vector.broadcast %cst_13 : f32 to vector<1x128xf32>
    %19 = arith.divf %18, %17 : vector<1x128xf32>
    %20 = math.exp %12 : vector<1x128xf32>
    %cst_14 = arith.constant 1.000000e+00 : f32
    %21 = vector.broadcast %cst_14 : f32 to vector<1x128xf32>
    %22 = arith.addf %21, %20 : vector<1x128xf32>
    %cst_15 = arith.constant 1.000000e+00 : f32
    %23 = vector.broadcast %cst_15 : f32 to vector<1x128xf32>
    %24 = arith.divf %23, %22 : vector<1x128xf32>
    %25 = tpu.concatenate %24, %19 in 0 : vector<1x128xf32>, vector<1x128xf32> -> vector<2x128xf32>
    %c0_16 = arith.constant 0 : index
    %c0_17 = arith.constant 0 : index
    %26 = vector.load %arg6[%c0_16, %c0_17] : memref<2x128xf32, #tpu.memory_space<vmem>>, vector<2x128xf32>
    tpu.vector_store %arg6[%c0_16, %c0_17], %25 {strides = array<i32>} : memref<2x128xf32, #tpu.memory_space<vmem>>, vector<2x128xf32>,
    return
  }
  func.func @transform_0(%arg0: i32) -> (i32, i32) {
    %c0_i32 = arith.constant 0 : i32
    %c0_i32_0 = arith.constant 0 : i32
    return %c0_i32, %arg0 : i32, i32
  }
  func.func @transform_1(%arg0: i32) -> (i32, i32) {
    %c0_i32 = arith.constant 0 : i32
    %c0_i32_0 = arith.constant 0 : i32
    %c0_i32_1 = arith.constant 0 : i32
    return %c0_i32, %c0_i32_0 : i32, i32
  }
  func.func @transform_2(%arg0: i32) -> (i32, i32) {
    %c0_i32 = arith.constant 0 : i32
    %c0_i32_0 = arith.constant 0 : i32
    %c0_i32_1 = arith.constant 0 : i32
    return %c0_i32, %c0_i32_0 : i32, i32
  }
  func.func @transform_3(%arg0: i32) -> (i32, i32) {
    %c0_i32 = arith.constant 0 : i32
    %c0_i32_0 = arith.constant 0 : i32
    %c0_i32_1 = arith.constant 0 : i32
    return %c0_i32, %c0_i32_0 : i32, i32
  }
  func.func @transform_4(%arg0: i32) -> (i32, i32) {
    %c0_i32 = arith.constant 0 : i32
    %c0_i32_0 = arith.constant 0 : i32
    %c0_i32_1 = arith.constant 0 : i32
    return %c0_i32, %c0_i32_0 : i32, i32
  }
  func.func @transform_5(%arg0: i32) -> (i32, i32) {
    %c0_i32 = arith.constant 0 : i32
    %c0_i32_0 = arith.constant 0 : i32
    return %c0_i32, %arg0 : i32, i32
  }
}

</mosaic_0001>

<bundles_post_ra>
// kernel: tpu_custom_call.1
= control target key start
LH: loop header
LB: loop body
LE: loop exit
PB: predicated region body
PF: predicated region fallthrough
CT: control target
= control target key end

     0   :  { %s438_s0 = inlined_call_operand.vmem [shape: f32[4,128], index: 0, kind: input, shape index: {}]   ;;  %s439_s1 = inlined_call_operand.vmem [shape: f32[32,4], index: 1, kind: input, shape index: {}]   ;;  %s440_s2 = inlined_call_operand.vmem [shape: f32[32,1], index: 2, kind: input, shape index: {}]   ;;  %s441_s3 = inlined_call_operand.vmem [shape: f32[1,32], index: 3, kind: input, shape index: {}]   ;;  %s442_s4 = inlined_call_operand.<no memory space> [shape: f32[1,1], index: 4, kind: input, shape index: {}]   ;;  %s443_s5 = inlined_call_operand.hbm [shape: f32[2,128], index: 5, kind: output, shape index: {}]  }
   0x1   :  { %v10_v0 = vstv %s442_s4 }
   0x2   :  { %11 = vst [vmem:[#allocation2] sm:$0x1] %v10_v0 }
   0x3   :  { %v23_v1 = vld [vmem:[%s438_s0] sm:$0xf]  ;;  %vm65_vm0 = vcmask 1043456   ;;  %vm52_vm1 = vcmask 31744   ;;  %v25_v3 = vld [vmem:[%s439_s1 + $0x8] sm:$0xff]  ;;  %v26_v4 = vld [vmem:[%s439_s1 + $0x10] sm:$0xff] }
   0x4   :  { %v24_v2 = vld [vmem:[%s439_s1] sm:$0xff]  ;;  %290 = vmatprep.subr.msk.mxu0 %vm65_vm0, %v23_v1  ;;  %v354_v6 = vmov 0   ;;  %v30_v7 = vld [vmem:[%s440_s2 + $0x10] sm:$0xff] }
   0x5   :  { %292 = vmatprep.mubr.msk.f32.mxu0 %vm52_vm1, %v24_v2  ;;  %v28_v5 = vld [vmem:[%s440_s2] sm:$0xff]  ;;  %291 = vmatpush3.msk.msra.mxu0 %vm65_vm0, %v23_v1 }
   0x6   :  { %320 = vset.pattern.permute.xlu0 %v354_v6  ;;  %293 = vmatmul.mubr.msk.f32.vlgmr.msra.gmra.mrb[0].mxu0 %vm52_vm1, %v25_v3 }
   0x7   :  { %34 = vperm.xlu0 %320, %v28_v5  }
   0x8   :  { %12 = vsyncpa [#allocation4], 0  ;;  %295 = vmatprep.mubr.msk.f32.mxu0 %vm52_vm1, %v26_v4  ;;  %v27_v8 = vld [vmem:[%s439_s1 + $0x18] sm:$0xff]  ;;  %v29_v9 = vld [vmem:[%s440_s2 + $0x8] sm:$0xff]  ;;  %321 = vset.pattern.permute.xlu1 %v354_v6  ;;  %v355_v12 = vmov 0.0|0.0   ;;  %vm356_vm2 = vmmov 0   ;;  %v165_v33 = vlaneseq }
   0x9   :  { %44 = vperm.xlu1 %321, %v30_v7   ;;  %v31_v10 = vld [vmem:[%s440_s2 + $0x18] sm:$0xff]  ;;  %v159_v11 = vld [vmem:[#allocation2] sm:$0x1]  ;;  %309 = vmatprep.subr.bf16.mxu1 %v355_v12  ;;  %v357_v13 = vmov 0.0   ;;  %vm169_vm3 = vcmask 261120   ;;  %vm257_vm4 = vcmask 1040384  }
   0xa   :  { %296 = vmatmul.mubr.msk.f32.gmra.mrb[2].mxu0 %vm52_vm1, %v27_v8  ;;  %306 = vmatprep.mubr.msk.f32.mxu1 %vm356_vm2, %v357_v13  ;;  %v158_v32 = vld [vmem:[%s441_s3] sm:$0x1]  ;;  %v166_v34 = vshrl.u32 %v165_v33, 7  ;;  %s358_s3 = smov [#allocation3]  }
   0xb   :  { %39 = vperm.xlu0 %320, %v29_v9   ;;  %s266_s11 = sshll.u32 %s358_s3, 4  ;;  %s267_s11 = int_to_ptr.vmem [resolvable:$true] %s266_s11 }
   0xc   :  { %v167_v35 = vsub.s32 0, %v166_v34  ;;  %s330_s12 = scalar_lea.vmem %s267_s11, 32  ;;  %p335_p1 = scmp.lt.s32.totalorder %s267_s11, %s267_s11 }
   0xd   :  { %49 = vperm.xlu1 %321, %v31_v10   ;;  %p331_p0 = scmp.ne.s32.totalorder %s267_s11, %s330_s12  ;;  %p336_p2 = scmp.lt.s32.totalorder %s330_s12, %s330_s12 }
   0xf   :  { %162 = vperm.xlu0 %320, %v159_v11   ;;  %p337_p3 = por %p336_p2, %p335_p1 }
  0x11   :  { %p338_p4 = pnand %p337_p3, %p331_p0 }
  0x86   :  { %v35_v14 = vpop.permute.xlu0 %34 }
  0x88   :  { %v45_v15 = vpop.permute.xlu1 %44 }
  0x8a   :  { %v40_v16 = vpop.permute.xlu0 %39 }
  0x8c   :  { %v50_v22 = vpop.permute.xlu1 %49 }
  0x8e   :  { %v163_v36 = vpop.permute.xlu0 %162 }
  0x8f   :  { %v168_v37 = vrot.slane %v163_v36, %v167_v35 }
  0xd9   :  { %v294_v17 = vpop.f32.mrb[0].mxu0 }
  0xda   :  { %v141_v18 = vadd.f32 %v294_v17, %v40_v16  ;;  %v135_v19 = vpop.f32.mrb[1].mxu0 }
  0xdb   :  { %v136_v20 = vadd.f32 %v135_v19, %v35_v14 }
  0xdc   :  { %v155_v21 = vmax.f32 %v141_v18, 0.0 }
  0xdd   :  { %v154_v23 = vmax.f32 %v136_v20, 0.0  ;;  %v297_v24 = vpop.f32.mrb[2].mxu0 }
  0xde   :  { %v151_v25 = vadd.f32 %v297_v24, %v50_v22  ;;  %v145_v26 = vpop.f32.mrb[3].mxu0 }
  0xdf   :  { %v146_v27 = vadd.f32 %v145_v26, %v45_v15  ;;  %v310_v28 = vpack.c.bf16 %v155_v21, %v154_v23 }
  0xe0   :  { %v157_v29 = vmax.f32 %v151_v25, 0.0 }
  0xe1   :  { %v156_v30 = vmax.f32 %v146_v27, 0.0  ;;  %311 = vmatpush3.bf16.msra.mxu1 %v310_v28 }
  0xe2   :  { %312 = vmatprep.subr.bf16.mxu1 %v355_v12 }
  0xe3   :  { %v313_v31 = vpack.c.bf16 %v157_v29, %v156_v30 }
  0xe5   :  { %314 = vmatpush3.bf16.msra.mxu1 %v313_v31 }
  0xe8   :  { %307 = vmatmul.mubr.msk.f32.vlgmr.msra.gmra.mrb[0].mxu1 %vm169_vm3, %v158_v32 }
 0x1bb   :  { %v239_v38 = vpop.f32.mrb[0].mxu1 }
 0x1bc   :  { %v240_v39 = vadd.f32 %v239_v38, %v168_v37  ;;  %v308_v40 = vpop.f32.mrb[1].mxu1 }
 0x1be   :  { %v243_v41 = vsub.f32 0.0, %v240_v39  ;;  %v249_v42 = vmul.f32 1.442695, %v240_v39 }
 0x1c0   :  { %v244_v43 = vmul.f32 1.442695, %v243_v41  ;;  %322 = vpow2.f32 %v249_v42 }
 0x1c2   :  { %324 = vpow2.f32 %v244_v43 }
 0x1ca   :  { %v323_v44 = vpop.eup %322 }
 0x1cb   :  { %v251_v47 = vadd.f32 1.0, %v323_v44 }
 0x1cc   :  { %v325_v45 = vpop.eup %324 }
 0x1cd   :  { %v246_v46 = vadd.f32 1.0, %v325_v45 }
 0x1cf   :  { %326 = vrcp.f32 %v246_v46 }
 0x1d0   :  { %328 = vrcp.f32 %v251_v47 }
 0x1d9   :  { %v327_v48 = vpop.eup %326 }
 0x1da   :  { %v255_v49 = vrot.slane %v327_v48, 7  ;;  %v329_v50 = vpop.eup %328 }
 0x1dc   :  { %v258_v51 = vsel %vm257_vm4, %v329_v50, %v255_v49 }
 0x1dd   :  { %259 = vst [vmem:[#allocation3] sm:$0x3] %v258_v51 }
 0x1de   :  { %341 = shalt.err (!%p338_p4)
}
 0x1df   :  { %s342_s15 = scalar_lea.hbm %s443_s5, 32 }
 0x1e0   :  { %p343_p5 = scmp.ne.s32.totalorder %s443_s5, %s342_s15  ;;  %p346_p6 = scmp.lt.u32.totalorder %s342_s15, %s443_s5 }
 0x1e2   :  { %p348_p7 = pnand %p346_p6, %p343_p5 }
 0x1e4   :  { %351 = shalt.err (!%p348_p7)
}
 0x1e5   :  { %269 = dma.vmem_to_hbm [thread:$0]  %s267_s11, 32, %s443_s5, [#allocation4]  }
 0x1e6   :  { %352 = dma.done.wait [#allocation4], 32  }
 0x1e7   :  { %353 = vsyncadd [#allocation4], 4294967264 }
 0x1e8   :  { %273 = vsyncpa [#allocation4], 1 }

</bundles_post_ra>
